<compile_context>
chip_gen: v7x
topology: tpu7x:2x2x1
jax: 0.10.0
libtpu: 0.0.40
codegen_flags: <defaults>
</compile_context>

<pallas_src>
import jax
import jax.numpy as jnp
from jax.experimental import pallas as pl
from jax.experimental.pallas import tpu as pltpu


def _decoder_kernel(
    ids_ref,      # SMEM (T*B,) int32 — scalar prefetch; row t*B+b = trg[b, t]
    enc_ref,      # (B, S, H)      f32
    hc0_ref,      # (2, B, H)      f32   [h0; c0]
    w_emb_ref,    # (V, 1, E)      f32   embedding table (leading-dim gather)
    w_ihb_ref,    # (E+1, 4H)      f32   rows 0..E-1 = w_ih^T, row E = b_ih+b_hh
    w_hh_ref,     # (H, 4H)        f32   fused recurrent weights (gate order i,f,g,o)
    w_k_ref,      # (H, H)         f32   attention key projection (used as h @ W)
    w_fcb_ref,    # (2H+1, TILE_V) f32   rows 0..H-1 h-half, H..2H-1 attn-half, 2H b_fc
    logits_ref,   # out (B, TILE_V)
    hc_ref,       # out (2, B, H)        [h'; c'] — V-resident block
    emb_sc,       # scratch VMEM (T*B, E)
    attn_sc,      # scratch VMEM (B, H)
):
    _, _, E = w_emb_ref.shape
    TB = emb_sc.shape[0]
    _, B, H = hc0_ref.shape
    T = TB // B
    S = enc_ref.shape[1]
    H2 = 2 * H

    # ------ Recurrence + attention: computed once, on the first V tile ------
    @pl.when(pl.program_id(0) == 0)
    def _recurrence_and_attention():
        # ---- Embedding: scalar-prefetched ids -> row gather (no one-hot) ----
        for k in range(TB):
            emb_sc[pl.ds(k, 1), :] = w_emb_ref[ids_ref[k]]        # (1, E)

        # ---- Input projection for ALL timesteps: one matmul + fused bias ----
        gx = (jnp.dot(emb_sc[...], w_ihb_ref[0:E, :],
                      preferred_element_type=jnp.float32)
              + w_ihb_ref[E:E + 1, :])                             # (TB, 4H)

        w_hh = w_hh_ref[...]                                       # (H, 4H)
        h = hc0_ref[0]                                             # (B, H)
        c = hc0_ref[1]                                             # (B, H)

        # ---- Serial LSTM recurrence: ONE fused (B,H)@(H,4H) dot per step ----
        for t in range(T):
            g = gx[t * B:(t + 1) * B, :] + jnp.dot(
                h, w_hh, preferred_element_type=jnp.float32)       # (B, 4H)
            sig = jax.nn.sigmoid(g)                                # 1 EUP pass
            th = jnp.tanh(g)                                       # 1 EUP pass
            i_g = sig[:, 0:H]
            f_g = sig[:, H:2 * H]
            g_g = th[:, 2 * H:3 * H]
            o_g = sig[:, 3 * H:4 * H]
            c = f_g * c + i_g * g_g
            h = o_g * jnp.tanh(c)

        hc_ref[0] = h
        hc_ref[1] = c

        # ---- Attention (batched; b_k dropped: shift-invariant softmax) -----
        q = jnp.dot(h, w_k_ref[...], preferred_element_type=jnp.float32)  # (B, H)
        enc = enc_ref[...]                                                 # (B, S, H)
        prod = enc * jnp.reshape(q, (B, 1, H))
        scores = jnp.sum(jnp.sum(prod, axis=2, keepdims=True), axis=0)     # (S, 1)
        m = jnp.max(scores, axis=0, keepdims=True)
        e = jnp.exp(scores - m)
        inv = pl.reciprocal(jnp.sum(e, axis=0, keepdims=True), approx=True)
        p = e * inv                                                         # (S, 1)
        attn_sc[...] = jnp.sum(enc * jnp.reshape(p, (1, S, 1)), axis=1)     # (B, H)

    # ------ FC on this V tile (every grid step; weight stream pipelined) ----
    h = hc_ref[0]
    attn = attn_sc[...]
    logits_ref[...] = (
        jnp.dot(h, w_fcb_ref[0:H, :], preferred_element_type=jnp.float32)
        + jnp.dot(attn, w_fcb_ref[H:H2, :], preferred_element_type=jnp.float32)
        + w_fcb_ref[H2:H2 + 1, :])


@jax.jit
def decoder_pallas(trg, enc_out, hidden, cell, params):
    B, T = trg.shape
    _, S, H = enc_out.shape
    V, E = params["w_emb"].shape

    V_pad = ((V + 127) // 128) * 128
    TILE_V = 512 if V_pad % 512 == 0 else 128
    num_v_tiles = V_pad // TILE_V

    # Token ids: row t*B + b corresponds to trg[b, t]; scalar-prefetched (SMEM).
    trg_flat = jnp.transpose(trg, (1, 0)).reshape(T * B).astype(jnp.int32)

    # Initial (h, c) merged into a single input.
    hc0 = jnp.stack([hidden[0], cell[0]], axis=0)                   # (2, B, H)

    # Embedding table with a pure leading gather axis.
    w_emb3 = params["w_emb"].reshape(V, 1, E)

    # Input projection weight + fused bias in one slab (E+1, 4H).
    w_ihb = jnp.concatenate(
        [params["w_ih"].T,
         (params["b_ih"] + params["b_hh"]).reshape(1, 4 * H)], axis=0)

    # Fused recurrent weights: h @ w_hh.T == h @ w_hh_all, gate order i,f,g,o.
    w_hh_all = params["w_hh"].T                                     # (H, 4H)

    # FC weight (h-half rows 0:H, attn-half rows H:2H) + bias row, lane-padded.
    pad = ((0, 0), (0, V_pad - V))
    w_fc_t = jnp.pad(params["w_fc"].T, pad)                         # (2H, V_pad)
    b_fc = jnp.pad(params["b_fc"].reshape(1, V), pad)               # (1, V_pad)
    w_fcb = jnp.concatenate([w_fc_t, b_fc], axis=0)                 # (2H+1, V_pad)

    grid_spec = pltpu.PrefetchScalarGridSpec(
        num_scalar_prefetch=1,
        grid=(num_v_tiles,),
        in_specs=[
            pl.BlockSpec((B, S, H), lambda j, ids: (0, 0, 0)),          # enc_out
            pl.BlockSpec((2, B, H), lambda j, ids: (0, 0, 0)),          # hc0
            pl.BlockSpec((V, 1, E), lambda j, ids: (0, 0, 0)),          # w_emb
            pl.BlockSpec((E + 1, 4 * H), lambda j, ids: (0, 0)),        # w_ih + b
            pl.BlockSpec((H, 4 * H), lambda j, ids: (0, 0)),            # w_hh fused
            pl.BlockSpec((H, H), lambda j, ids: (0, 0)),                # w_k
            pl.BlockSpec((2 * H + 1, TILE_V), lambda j, ids: (0, j)),   # fc + b_fc
        ],
        out_specs=[
            pl.BlockSpec((B, TILE_V), lambda j, ids: (0, j)),           # logits tile
            pl.BlockSpec((2, B, H), lambda j, ids: (0, 0, 0)),          # [h'; c']
        ],
        scratch_shapes=[
            pltpu.VMEM((T * B, E), jnp.float32),                        # emb rows
            pltpu.VMEM((B, H), jnp.float32),                            # attn values
        ],
    )

    flops = (2 * T * B * E * 4 * H            # input projection
             + 2 * T * B * H * 4 * H          # recurrence
             + 2 * B * H * H                  # attention query
             + 4 * B * S * H                  # scores + values
             + 2 * B * 2 * H * V_pad)         # final FC
    transcendentals = T * B * 8 * H + S
    bytes_accessed = 4 * (T * B + B * S * H + 2 * B * H + V * E
                          + (E + 1) * 4 * H + H * 4 * H + H * H
                          + (2 * H + 1) * V_pad + B * V_pad + 2 * B * H)

    logits_pad, hc = pl.pallas_call(
        _decoder_kernel,
        out_shape=(
            jax.ShapeDtypeStruct((B, V_pad), jnp.float32),
            jax.ShapeDtypeStruct((2, B, H), jnp.float32),
        ),
        grid_spec=grid_spec,
        compiler_params=pltpu.CompilerParams(
            # "arbitrary": the j==0 phase initialises the resident hc/attn
            # state that later V tiles read; a megacore-parallel split of the
            # V axis would skip that init on the second core.
            dimension_semantics=("arbitrary",)),
        cost_estimate=pl.CostEstimate(
            flops=flops, transcendentals=transcendentals,
            bytes_accessed=bytes_accessed),
    )(trg_flat, enc_out, hc0, w_emb3, w_ihb, w_hh_all, params["w_k"], w_fcb)

    return logits_pad[:, :V], hc[0][None, :, :], hc[1][None, :, :]


def decoder_reference(trg, enc_out, hidden, cell, params):
    """Pure-JAX mirror of the PyTorch forward."""
    B, T = trg.shape
    H = hidden.shape[-1]
    emb = params["w_emb"][trg]                   # (B, T, E)
    h = hidden[0]
    c = cell[0]
    for t in range(T):
        x_t = emb[:, t, :]
        gates = (x_t @ params["w_ih"].T + h @ params["w_hh"].T
                 + params["b_ih"] + params["b_hh"])
        i_g = jax.nn.sigmoid(gates[:, 0:H])
        f_g = jax.nn.sigmoid(gates[:, H:2 * H])
        g_g = jnp.tanh(gates[:, 2 * H:3 * H])
        o_g = jax.nn.sigmoid(gates[:, 3 * H:4 * H])
        c = f_g * c + i_g * g_g
        h = o_g * jnp.tanh(c)

    attn_key = enc_out @ params["w_k"].T + params["b_k"]            # (B, S, H)
    S = enc_out.shape[1]
    attn_key_flat = jnp.transpose(attn_key, (1, 0, 2)).reshape(S, B * H)
    attn_query = h.reshape(-1, 1)                                   # (B*H, 1)
    scores = attn_key_flat @ attn_query                             # (S, 1)
    scores = jax.nn.softmax(scores, axis=0)
    scores_b = jnp.broadcast_to(scores.reshape(1, 1, S), (B, 1, S))
    attn_vals = jnp.einsum("bos,bsh->boh", scores_b, enc_out)[:, 0]  # (B, H)
    x = jnp.concatenate([h, attn_vals], axis=1)                     # (B, 2H)
    logits = x @ params["w_fc"].T + params["b_fc"]
    return logits, h[None], c[None]


if __name__ == "__main__":
    # Small shapes consistent with the module.
    V = 32          # vocab_size_trg
    E = 8           # embedding_dim
    H = 4 * E       # LSTM hidden size = 32
    B = 2           # batch
    T = 4           # target sequence length
    S = 6           # encoder (source) sequence length

    key = jax.random.PRNGKey(0)
    ks = jax.random.split(key, 12)

    params = {
        "w_emb": jax.random.normal(ks[0], (V, E), jnp.float32) * 0.1,
        "w_ih":  jax.random.normal(ks[1], (4 * H, E), jnp.float32) * 0.1,
        "w_hh":  jax.random.normal(ks[2], (4 * H, H), jnp.float32) * 0.1,
        "b_ih":  jax.random.normal(ks[3], (4 * H,), jnp.float32) * 0.1,
        "b_hh":  jax.random.normal(ks[4], (4 * H,), jnp.float32) * 0.1,
        "w_k":   jax.random.normal(ks[5], (H, H), jnp.float32) * 0.1,
        "b_k":   jax.random.normal(ks[6], (H,), jnp.float32) * 0.1,
        "w_fc":  jax.random.normal(ks[7], (V, 2 * H), jnp.float32) * 0.1,
        "b_fc":  jax.random.normal(ks[8], (V,), jnp.float32) * 0.1,
    }

    trg = jax.random.randint(ks[9], (B, T), 0, V, jnp.int32)
    enc_out = jax.random.normal(ks[10], (B, S, H), jnp.float32)
    hc_key1, hc_key2 = jax.random.split(ks[11])
    hidden = jax.random.normal(hc_key1, (1, B, H), jnp.float32) * 0.1
    cell = jax.random.normal(hc_key2, (1, B, H), jnp.float32) * 0.1

    logits, h_out, c_out = decoder_pallas(trg, enc_out, hidden, cell, params)
    jax.block_until_ready((logits, h_out, c_out))

    ref_logits, ref_h, ref_c = decoder_reference(trg, enc_out, hidden, cell, params)
    assert logits.shape == (B, V) and h_out.shape == (1, B, H) and c_out.shape == (1, B, H)
    assert jnp.allclose(logits, ref_logits, rtol=2e-3, atol=2e-3)
    assert jnp.allclose(h_out, ref_h, rtol=2e-3, atol=2e-3)
    assert jnp.allclose(c_out, ref_c, rtol=2e-3, atol=2e-3)

    print("KERNEL_OK")
</pallas_src>

<mosaic_0001>
module attributes {stable_mosaic.version = 11 : i64} {
  func.func @_decoder_kernel(%arg0: i32, %arg1: memref<8xi32, #tpu.memory_space<smem>>, %arg2: memref<2x6x32xf32, #tpu.memory_space<vmem>>, %arg3: memref<2x2x32xf32, #tpu.memory_space<vmem>>, %arg4: memref<32x1x8xf32, #tpu.memory_space<vmem>>, %arg5: memref<9x128xf32, #tpu.memory_space<vmem>>, %arg6: memref<32x128xf32, #tpu.memory_space<vmem>>, %arg7: memref<32x32xf32, #tpu.memory_space<vmem>>, %arg8: memref<65x128xf32, #tpu.memory_space<vmem>>, %arg9: memref<2x128xf32, #tpu.memory_space<vmem>>, %arg10: memref<2x2x32xf32, #tpu.memory_space<vmem>>, %arg11: memref<8x8xf32, #tpu.memory_space<vmem>>, %arg12: memref<2x32xf32, #tpu.memory_space<vmem>>) attributes {dimension_semantics = [#tpu.dimension_semantics<arbitrary>], iteration_bounds = array<i64: 1>, scalar_prefetch = 1 : i64, scratch_operands = 2 : i64, tpu.core_type = #tpu.core_type<tc>, window_params = [{pipeline_mode = #tpu.pipeline_mode<synchronous>, transform_indices = @transform_0, window_bounds = array<i64: 2, 6, 32>}, {pipeline_mode = #tpu.pipeline_mode<synchronous>, transform_indices = @transform_1, window_bounds = array<i64: 2, 2, 32>}, {pipeline_mode = #tpu.pipeline_mode<synchronous>, transform_indices = @transform_2, window_bounds = array<i64: 32, 1, 8>}, {pipeline_mode = #tpu.pipeline_mode<synchronous>, transform_indices = @transform_3, window_bounds = array<i64: 9, 128>}, {pipeline_mode = #tpu.pipeline_mode<synchronous>, transform_indices = @transform_4, window_bounds = array<i64: 32, 128>}, {pipeline_mode = #tpu.pipeline_mode<synchronous>, transform_indices = @transform_5, window_bounds = array<i64: 32, 32>}, {transform_indices = @transform_6, window_bounds = array<i64: 65, 128>}, {transform_indices = @transform_7, window_bounds = array<i64: 2, 128>}, {pipeline_mode = #tpu.pipeline_mode<synchronous>, transform_indices = @transform_8, window_bounds = array<i64: 2, 2, 32>}]} {
    %c0_i32 = arith.constant 0 : i32
    %0 = arith.cmpi eq, %arg0, %c0_i32 : i32
    %1 = arith.extui %0 : i1 to i32
    %c0_i32_0 = arith.constant 0 : i32
    %2 = arith.cmpi ne, %1, %c0_i32_0 : i32
    scf.if %2 {
      %c0_12 = arith.constant 0 : index
      %15 = memref.load %arg1[%c0_12] : memref<8xi32, #tpu.memory_space<smem>>
      %16 = arith.index_cast %15 : i32 to index
      %c0_13 = arith.constant 0 : index
      %c0_14 = arith.constant 0 : index
      %17 = vector.load %arg4[%16, %c0_13, %c0_14] : memref<32x1x8xf32, #tpu.memory_space<vmem>>, vector<1x1x8xf32>
      %18 = vector.shape_cast %17 : vector<1x1x8xf32> to vector<1x8xf32>
      %c0_15 = arith.constant 0 : index
      %c0_16 = arith.constant 0 : index
      %19 = vector.load %arg11[%c0_15, %c0_16] : memref<8x8xf32, #tpu.memory_space<vmem>>, vector<1x8xf32>
      tpu.vector_store %arg11[%c0_15, %c0_16], %18 {strides = array<i32>} : memref<8x8xf32, #tpu.memory_space<vmem>>, vector<1x8xf32>,
      %c1 = arith.constant 1 : index
      %20 = memref.load %arg1[%c1] : memref<8xi32, #tpu.memory_space<smem>>
      %21 = arith.index_cast %20 : i32 to index
      %c0_17 = arith.constant 0 : index
      %c0_18 = arith.constant 0 : index
      %22 = vector.load %arg4[%21, %c0_17, %c0_18] : memref<32x1x8xf32, #tpu.memory_space<vmem>>, vector<1x1x8xf32>
      %23 = vector.shape_cast %22 : vector<1x1x8xf32> to vector<1x8xf32>
      %c1_19 = arith.constant 1 : index
      %c0_20 = arith.constant 0 : index
      %24 = vector.load %arg11[%c1_19, %c0_20] : memref<8x8xf32, #tpu.memory_space<vmem>>, vector<1x8xf32>
      tpu.vector_store %arg11[%c1_19, %c0_20], %23 {strides = array<i32>} : memref<8x8xf32, #tpu.memory_space<vmem>>, vector<1x8xf32>,
      %c2 = arith.constant 2 : index
      %25 = memref.load %arg1[%c2] : memref<8xi32, #tpu.memory_space<smem>>
      %26 = arith.index_cast %25 : i32 to index
      %c0_21 = arith.constant 0 : index
      %c0_22 = arith.constant 0 : index
      %27 = vector.load %arg4[%26, %c0_21, %c0_22] : memref<32x1x8xf32, #tpu.memory_space<vmem>>, vector<1x1x8xf32>
      %28 = vector.shape_cast %27 : vector<1x1x8xf32> to vector<1x8xf32>
      %c2_23 = arith.constant 2 : index
      %c0_24 = arith.constant 0 : index
      %29 = vector.load %arg11[%c2_23, %c0_24] : memref<8x8xf32, #tpu.memory_space<vmem>>, vector<1x8xf32>
      tpu.vector_store %arg11[%c2_23, %c0_24], %28 {strides = array<i32>} : memref<8x8xf32, #tpu.memory_space<vmem>>, vector<1x8xf32>,
      %c3 = arith.constant 3 : index
      %30 = memref.load %arg1[%c3] : memref<8xi32, #tpu.memory_space<smem>>
      %31 = arith.index_cast %30 : i32 to index
      %c0_25 = arith.constant 0 : index
      %c0_26 = arith.constant 0 : index
      %32 = vector.load %arg4[%31, %c0_25, %c0_26] : memref<32x1x8xf32, #tpu.memory_space<vmem>>, vector<1x1x8xf32>
      %33 = vector.shape_cast %32 : vector<1x1x8xf32> to vector<1x8xf32>
      %c3_27 = arith.constant 3 : index
      %c0_28 = arith.constant 0 : index
      %34 = vector.load %arg11[%c3_27, %c0_28] : memref<8x8xf32, #tpu.memory_space<vmem>>, vector<1x8xf32>
      tpu.vector_store %arg11[%c3_27, %c0_28], %33 {strides = array<i32>} : memref<8x8xf32, #tpu.memory_space<vmem>>, vector<1x8xf32>,
      %c4 = arith.constant 4 : index
      %35 = memref.load %arg1[%c4] : memref<8xi32, #tpu.memory_space<smem>>
      %36 = arith.index_cast %35 : i32 to index
      %c0_29 = arith.constant 0 : index
      %c0_30 = arith.constant 0 : index
      %37 = vector.load %arg4[%36, %c0_29, %c0_30] : memref<32x1x8xf32, #tpu.memory_space<vmem>>, vector<1x1x8xf32>
      %38 = vector.shape_cast %37 : vector<1x1x8xf32> to vector<1x8xf32>
      %c4_31 = arith.constant 4 : index
      %c0_32 = arith.constant 0 : index
      %39 = vector.load %arg11[%c4_31, %c0_32] : memref<8x8xf32, #tpu.memory_space<vmem>>, vector<1x8xf32>
      tpu.vector_store %arg11[%c4_31, %c0_32], %38 {strides = array<i32>} : memref<8x8xf32, #tpu.memory_space<vmem>>, vector<1x8xf32>,
      %c5 = arith.constant 5 : index
      %40 = memref.load %arg1[%c5] : memref<8xi32, #tpu.memory_space<smem>>
      %41 = arith.index_cast %40 : i32 to index
      %c0_33 = arith.constant 0 : index
      %c0_34 = arith.constant 0 : index
      %42 = vector.load %arg4[%41, %c0_33, %c0_34] : memref<32x1x8xf32, #tpu.memory_space<vmem>>, vector<1x1x8xf32>
      %43 = vector.shape_cast %42 : vector<1x1x8xf32> to vector<1x8xf32>
      %c5_35 = arith.constant 5 : index
      %c0_36 = arith.constant 0 : index
      %44 = vector.load %arg11[%c5_35, %c0_36] : memref<8x8xf32, #tpu.memory_space<vmem>>, vector<1x8xf32>
      tpu.vector_store %arg11[%c5_35, %c0_36], %43 {strides = array<i32>} : memref<8x8xf32, #tpu.memory_space<vmem>>, vector<1x8xf32>,
      %c6 = arith.constant 6 : index
      %45 = memref.load %arg1[%c6] : memref<8xi32, #tpu.memory_space<smem>>
      %46 = arith.index_cast %45 : i32 to index
      %c0_37 = arith.constant 0 : index
      %c0_38 = arith.constant 0 : index
      %47 = vector.load %arg4[%46, %c0_37, %c0_38] : memref<32x1x8xf32, #tpu.memory_space<vmem>>, vector<1x1x8xf32>
      %48 = vector.shape_cast %47 : vector<1x1x8xf32> to vector<1x8xf32>
      %c6_39 = arith.constant 6 : index
      %c0_40 = arith.constant 0 : index
      %49 = vector.load %arg11[%c6_39, %c0_40] : memref<8x8xf32, #tpu.memory_space<vmem>>, vector<1x8xf32>
      tpu.vector_store %arg11[%c6_39, %c0_40], %48 {strides = array<i32>} : memref<8x8xf32, #tpu.memory_space<vmem>>, vector<1x8xf32>,
      %c7 = arith.constant 7 : index
      %50 = memref.load %arg1[%c7] : memref<8xi32, #tpu.memory_space<smem>>
      %51 = arith.index_cast %50 : i32 to index
      %c0_41 = arith.constant 0 : index
      %c0_42 = arith.constant 0 : index
      %52 = vector.load %arg4[%51, %c0_41, %c0_42] : memref<32x1x8xf32, #tpu.memory_space<vmem>>, vector<1x1x8xf32>
      %53 = vector.shape_cast %52 : vector<1x1x8xf32> to vector<1x8xf32>
      %c7_43 = arith.constant 7 : index
      %c0_44 = arith.constant 0 : index
      %54 = vector.load %arg11[%c7_43, %c0_44] : memref<8x8xf32, #tpu.memory_space<vmem>>, vector<1x8xf32>
      tpu.vector_store %arg11[%c7_43, %c0_44], %53 {strides = array<i32>} : memref<8x8xf32, #tpu.memory_space<vmem>>, vector<1x8xf32>,
      %c0_45 = arith.constant 0 : index
      %c0_46 = arith.constant 0 : index
      %55 = vector.load %arg11[%c0_45, %c0_46] : memref<8x8xf32, #tpu.memory_space<vmem>>, vector<8x8xf32>
      %c0_47 = arith.constant 0 : index
      %c0_48 = arith.constant 0 : index
      %56 = vector.load %arg5[%c0_47, %c0_48] : memref<9x128xf32, #tpu.memory_space<vmem>>, vector<8x128xf32>
      %cst_49 = arith.constant dense<0.000000e+00> : vector<8x128xf32>
      %57 = tpu.matmul %55, %56, %cst_49 {dimension_numbers = #tpu.dot_dimension_numbers<[1], [0], [0], [1], [0, 0, 1, 1], [], []>} : vector<8x8xf32>, vector<8x128xf32>, vector<8x128xf32> -> vector<8x128xf32>
      %c8 = arith.constant 8 : index
      %c0_50 = arith.constant 0 : index
      %58 = vector.load %arg5[%c8, %c0_50] : memref<9x128xf32, #tpu.memory_space<vmem>>, vector<1x128xf32>
      %59 = vector.broadcast %58 : vector<1x128xf32> to vector<8x128xf32>
      %60 = arith.addf %57, %59 : vector<8x128xf32>
      %c0_51 = arith.constant 0 : index
      %c0_52 = arith.constant 0 : index
      %61 = vector.load %arg6[%c0_51, %c0_52] : memref<32x128xf32, #tpu.memory_space<vmem>>, vector<32x128xf32>
      %c0_53 = arith.constant 0 : index
      %c0_54 = arith.constant 0 : index
      %c0_55 = arith.constant 0 : index
      %62 = vector.load %arg3[%c0_53, %c0_54, %c0_55] : memref<2x2x32xf32, #tpu.memory_space<vmem>>, vector<1x2x32xf32>
      %63 = vector.shape_cast %62 : vector<1x2x32xf32> to vector<2x32xf32>
      %c1_56 = arith.constant 1 : index
      %c0_57 = arith.constant 0 : index
      %c0_58 = arith.constant 0 : index
      %64 = vector.load %arg3[%c1_56, %c0_57, %c0_58] : memref<2x2x32xf32, #tpu.memory_space<vmem>>, vector<1x2x32xf32>
      %65 = vector.shape_cast %64 : vector<1x2x32xf32> to vector<2x32xf32>
      %66 = vector.extract_strided_slice %60 {offsets = [0, 0], sizes = [2, 128], strides = [1, 1]} : vector<8x128xf32> to vector<2x128xf32>
      %cst_59 = arith.constant dense<0.000000e+00> : vector<2x128xf32>
      %67 = tpu.matmul %63, %61, %cst_59 {dimension_numbers = #tpu.dot_dimension_numbers<[1], [0], [0], [1], [0, 0, 1, 1], [], []>} : vector<2x32xf32>, vector<32x128xf32>, vector<2x128xf32> -> vector<2x128xf32>
      %68 = arith.addf %66, %67 : vector<2x128xf32>
      %69 = arith.negf %68 : vector<2x128xf32>
      %70 = math.exp %69 : vector<2x128xf32>
      %cst_60 = arith.constant 1.000000e+00 : f32
      %71 = vector.broadcast %cst_60 : f32 to vector<2x128xf32>
      %72 = arith.addf %71, %70 : vector<2x128xf32>
      %73 = arith.divf %71, %72 : vector<2x128xf32>
      %74 = math.tanh %68 : vector<2x128xf32>
      %75 = vector.extract_strided_slice %73 {offsets = [0, 0], sizes = [2, 32], strides = [1, 1]} : vector<2x128xf32> to vector<2x32xf32>
      %76 = vector.extract_strided_slice %73 {offsets = [0, 32], sizes = [2, 32], strides = [1, 1]} : vector<2x128xf32> to vector<2x32xf32>
      %77 = vector.extract_strided_slice %74 {offsets = [0, 64], sizes = [2, 32], strides = [1, 1]} : vector<2x128xf32> to vector<2x32xf32>
      %78 = vector.extract_strided_slice %73 {offsets = [0, 96], sizes = [2, 32], strides = [1, 1]} : vector<2x128xf32> to vector<2x32xf32>
      %79 = arith.mulf %76, %65 : vector<2x32xf32>
      %80 = arith.mulf %75, %77 : vector<2x32xf32>
      %81 = arith.addf %79, %80 : vector<2x32xf32>
      %82 = math.tanh %81 : vector<2x32xf32>
      %83 = arith.mulf %78, %82 : vector<2x32xf32>
      %84 = vector.extract_strided_slice %60 {offsets = [2, 0], sizes = [2, 128], strides = [1, 1]} : vector<8x128xf32> to vector<2x128xf32>
      %cst_61 = arith.constant dense<0.000000e+00> : vector<2x128xf32>
      %85 = tpu.matmul %83, %61, %cst_61 {dimension_numbers = #tpu.dot_dimension_numbers<[1], [0], [0], [1], [0, 0, 1, 1], [], []>} : vector<2x32xf32>, vector<32x128xf32>, vector<2x128xf32> -> vector<2x128xf32>
      %86 = arith.addf %84, %85 : vector<2x128xf32>
      %87 = arith.negf %86 : vector<2x128xf32>
      %88 = math.exp %87 : vector<2x128xf32>
      %cst_62 = arith.constant 1.000000e+00 : f32
      %89 = vector.broadcast %cst_62 : f32 to vector<2x128xf32>
      %90 = arith.addf %89, %88 : vector<2x128xf32>
      %91 = arith.divf %89, %90 : vector<2x128xf32>
      %92 = math.tanh %86 : vector<2x128xf32>
      %93 = vector.extract_strided_slice %91 {offsets = [0, 0], sizes = [2, 32], strides = [1, 1]} : vector<2x128xf32> to vector<2x32xf32>
      %94 = vector.extract_strided_slice %91 {offsets = [0, 32], sizes = [2, 32], strides = [1, 1]} : vector<2x128xf32> to vector<2x32xf32>
      %95 = vector.extract_strided_slice %92 {offsets = [0, 64], sizes = [2, 32], strides = [1, 1]} : vector<2x128xf32> to vector<2x32xf32>
      %96 = vector.extract_strided_slice %91 {offsets = [0, 96], sizes = [2, 32], strides = [1, 1]} : vector<2x128xf32> to vector<2x32xf32>
      %97 = arith.mulf %94, %81 : vector<2x32xf32>
      %98 = arith.mulf %93, %95 : vector<2x32xf32>
      %99 = arith.addf %97, %98 : vector<2x32xf32>
      %100 = math.tanh %99 : vector<2x32xf32>
      %101 = arith.mulf %96, %100 : vector<2x32xf32>
      %102 = vector.extract_strided_slice %60 {offsets = [4, 0], sizes = [2, 128], strides = [1, 1]} : vector<8x128xf32> to vector<2x128xf32>
      %cst_63 = arith.constant dense<0.000000e+00> : vector<2x128xf32>
      %103 = tpu.matmul %101, %61, %cst_63 {dimension_numbers = #tpu.dot_dimension_numbers<[1], [0], [0], [1], [0, 0, 1, 1], [], []>} : vector<2x32xf32>, vector<32x128xf32>, vector<2x128xf32> -> vector<2x128xf32>
      %104 = arith.addf %102, %103 : vector<2x128xf32>
      %105 = arith.negf %104 : vector<2x128xf32>
      %106 = math.exp %105 : vector<2x128xf32>
      %cst_64 = arith.constant 1.000000e+00 : f32
      %107 = vector.broadcast %cst_64 : f32 to vector<2x128xf32>
      %108 = arith.addf %107, %106 : vector<2x128xf32>
      %109 = arith.divf %107, %108 : vector<2x128xf32>
      %110 = math.tanh %104 : vector<2x128xf32>
      %111 = vector.extract_strided_slice %109 {offsets = [0, 0], sizes = [2, 32], strides = [1, 1]} : vector<2x128xf32> to vector<2x32xf32>
      %112 = vector.extract_strided_slice %109 {offsets = [0, 32], sizes = [2, 32], strides = [1, 1]} : vector<2x128xf32> to vector<2x32xf32>
      %113 = vector.extract_strided_slice %110 {offsets = [0, 64], sizes = [2, 32], strides = [1, 1]} : vector<2x128xf32> to vector<2x32xf32>
      %114 = vector.extract_strided_slice %109 {offsets = [0, 96], sizes = [2, 32], strides = [1, 1]} : vector<2x128xf32> to vector<2x32xf32>
      %115 = arith.mulf %112, %99 : vector<2x32xf32>
      %116 = arith.mulf %111, %113 : vector<2x32xf32>
      %117 = arith.addf %115, %116 : vector<2x32xf32>
      %118 = math.tanh %117 : vector<2x32xf32>
      %119 = arith.mulf %114, %118 : vector<2x32xf32>
      %120 = vector.extract_strided_slice %60 {offsets = [6, 0], sizes = [2, 128], strides = [1, 1]} : vector<8x128xf32> to vector<2x128xf32>
      %cst_65 = arith.constant dense<0.000000e+00> : vector<2x128xf32>
      %121 = tpu.matmul %119, %61, %cst_65 {dimension_numbers = #tpu.dot_dimension_numbers<[1], [0], [0], [1], [0, 0, 1, 1], [], []>} : vector<2x32xf32>, vector<32x128xf32>, vector<2x128xf32> -> vector<2x128xf32>
      %122 = arith.addf %120, %121 : vector<2x128xf32>
      %123 = arith.negf %122 : vector<2x128xf32>
      %124 = math.exp %123 : vector<2x128xf32>
      %cst_66 = arith.constant 1.000000e+00 : f32
      %125 = vector.broadcast %cst_66 : f32 to vector<2x128xf32>
      %126 = arith.addf %125, %124 : vector<2x128xf32>
      %127 = arith.divf %125, %126 : vector<2x128xf32>
      %128 = math.tanh %122 : vector<2x128xf32>
      %129 = vector.extract_strided_slice %127 {offsets = [0, 0], sizes = [2, 32], strides = [1, 1]} : vector<2x128xf32> to vector<2x32xf32>
      %130 = vector.extract_strided_slice %127 {offsets = [0, 32], sizes = [2, 32], strides = [1, 1]} : vector<2x128xf32> to vector<2x32xf32>
      %131 = vector.extract_strided_slice %128 {offsets = [0, 64], sizes = [2, 32], strides = [1, 1]} : vector<2x128xf32> to vector<2x32xf32>
      %132 = vector.extract_strided_slice %127 {offsets = [0, 96], sizes = [2, 32], strides = [1, 1]} : vector<2x128xf32> to vector<2x32xf32>
      %133 = arith.mulf %130, %117 : vector<2x32xf32>
      %134 = arith.mulf %129, %131 : vector<2x32xf32>
      %135 = arith.addf %133, %134 : vector<2x32xf32>
      %136 = math.tanh %135 : vector<2x32xf32>
      %137 = arith.mulf %132, %136 : vector<2x32xf32>
      %c0_67 = arith.constant 0 : index
      %c0_68 = arith.constant 0 : index
      %c0_69 = arith.constant 0 : index
      %138 = vector.load %arg10[%c0_67, %c0_68, %c0_69] : memref<2x2x32xf32, #tpu.memory_space<vmem>>, vector<1x2x32xf32>
      %139 = vector.shape_cast %138 : vector<1x2x32xf32> to vector<2x32xf32>
      %140 = vector.shape_cast %137 : vector<2x32xf32> to vector<1x2x32xf32>
      tpu.vector_store %arg10[%c0_67, %c0_68, %c0_69], %140 {strides = array<i32>} : memref<2x2x32xf32, #tpu.memory_space<vmem>>, vector<1x2x32xf32>,
      %c1_70 = arith.constant 1 : index
      %c0_71 = arith.constant 0 : index
      %c0_72 = arith.constant 0 : index
      %141 = vector.load %arg10[%c1_70, %c0_71, %c0_72] : memref<2x2x32xf32, #tpu.memory_space<vmem>>, vector<1x2x32xf32>
      %142 = vector.shape_cast %141 : vector<1x2x32xf32> to vector<2x32xf32>
      %143 = vector.shape_cast %135 : vector<2x32xf32> to vector<1x2x32xf32>
      tpu.vector_store %arg10[%c1_70, %c0_71, %c0_72], %143 {strides = array<i32>} : memref<2x2x32xf32, #tpu.memory_space<vmem>>, vector<1x2x32xf32>,
      %c0_73 = arith.constant 0 : index
      %c0_74 = arith.constant 0 : index
      %144 = vector.load %arg7[%c0_73, %c0_74] : memref<32x32xf32, #tpu.memory_space<vmem>>, vector<32x32xf32>
      %cst_75 = arith.constant dense<0.000000e+00> : vector<2x32xf32>
      %145 = tpu.matmul %137, %144, %cst_75 {dimension_numbers = #tpu.dot_dimension_numbers<[1], [0], [0], [1], [0, 0, 1, 1], [], []>} : vector<2x32xf32>, vector<32x32xf32>, vector<2x32xf32> -> vector<2x32xf32>
      %c0_76 = arith.constant 0 : index
      %c0_77 = arith.constant 0 : index
      %c0_78 = arith.constant 0 : index
      %146 = vector.load %arg2[%c0_76, %c0_77, %c0_78] : memref<2x6x32xf32, #tpu.memory_space<vmem>>, vector<2x6x32xf32>
      %147 = vector.shape_cast %145 : vector<2x32xf32> to vector<2x1x32xf32>
      %148 = vector.broadcast %147 : vector<2x1x32xf32> to vector<2x6x32xf32>
      %149 = arith.mulf %146, %148 : vector<2x6x32xf32>
      %cst_79 = arith.constant dense<0.000000e+00> : vector<2x6xf32>
      %150 = vector.multi_reduction <add>, %149, %cst_79 [2] : vector<2x6x32xf32> to vector<2x6xf32>
      %151 = vector.shape_cast %150 : vector<2x6xf32> to vector<2x6x1xf32>
      %cst_80 = arith.constant dense<0.000000e+00> : vector<6x1xf32>
      %152 = vector.multi_reduction <add>, %151, %cst_80 [0] : vector<2x6x1xf32> to vector<6x1xf32>
      %cst_81 = arith.constant dense<0xFF800000> : vector<1xf32>
      %153 = vector.multi_reduction <maximumf>, %152, %cst_81 [0] : vector<6x1xf32> to vector<1xf32>
      %154 = vector.shape_cast %153 : vector<1xf32> to vector<1x1xf32>
      %155 = vector.broadcast %154 : vector<1x1xf32> to vector<6x1xf32>
      %156 = arith.subf %152, %155 : vector<6x1xf32>
      %157 = math.exp %156 : vector<6x1xf32>
      %cst_82 = arith.constant dense<0.000000e+00> : vector<1xf32>
      %158 = vector.multi_reduction <add>, %157, %cst_82 [0] : vector<6x1xf32> to vector<1xf32>
      %159 = vector.shape_cast %158 : vector<1xf32> to vector<1x1xf32>
      %160 = tpu.reciprocal %159 {approx = true} : vector<1x1xf32> -> vector<1x1xf32>
      %161 = vector.broadcast %160 : vector<1x1xf32> to vector<6x1xf32>
      %162 = arith.mulf %157, %161 : vector<6x1xf32>
      %163 = vector.shape_cast %162 : vector<6x1xf32> to vector<1x6x1xf32>
      %164 = vector.broadcast %163 : vector<1x6x1xf32> to vector<2x6x32xf32>
      %165 = arith.mulf %146, %164 : vector<2x6x32xf32>
      %cst_83 = arith.constant dense<0.000000e+00> : vector<2x32xf32>
      %166 = vector.multi_reduction <add>, %165, %cst_83 [1] : vector<2x6x32xf32> to vector<2x32xf32>
      %c0_84 = arith.constant 0 : index
      %c0_85 = arith.constant 0 : index
      %167 = vector.load %arg12[%c0_84, %c0_85] : memref<2x32xf32, #tpu.memory_space<vmem>>, vector<2x32xf32>
      tpu.vector_store %arg12[%c0_84, %c0_85], %166 {strides = array<i32>} : memref<2x32xf32, #tpu.memory_space<vmem>>, vector<2x32xf32>,
    } else {
    }
    %c0 = arith.constant 0 : index
    %c0_1 = arith.constant 0 : index
    %c0_2 = arith.constant 0 : index
    %3 = vector.load %arg10[%c0, %c0_1, %c0_2] : memref<2x2x32xf32, #tpu.memory_space<vmem>>, vector<1x2x32xf32>
    %4 = vector.shape_cast %3 : vector<1x2x32xf32> to vector<2x32xf32>
    %c0_3 = arith.constant 0 : index
    %c0_4 = arith.constant 0 : index
    %5 = vector.load %arg12[%c0_3, %c0_4] : memref<2x32xf32, #tpu.memory_space<vmem>>, vector<2x32xf32>
    %c0_5 = arith.constant 0 : index
    %c0_6 = arith.constant 0 : index
    %6 = vector.load %arg8[%c0_5, %c0_6] : memref<65x128xf32, #tpu.memory_space<vmem>>, vector<32x128xf32>
    %cst = arith.constant dense<0.000000e+00> : vector<2x128xf32>
    %7 = tpu.matmul %4, %6, %cst {dimension_numbers = #tpu.dot_dimension_numbers<[1], [0], [0], [1], [0, 0, 1, 1], [], []>} : vector<2x32xf32>, vector<32x128xf32>, vector<2x128xf32> -> vector<2x128xf32>
    %c32 = arith.constant 32 : index
    %c0_7 = arith.constant 0 : index
    %8 = vector.load %arg8[%c32, %c0_7] : memref<65x128xf32, #tpu.memory_space<vmem>>, vector<32x128xf32>
    %cst_8 = arith.constant dense<0.000000e+00> : vector<2x128xf32>
    %9 = tpu.matmul %5, %8, %cst_8 {dimension_numbers = #tpu.dot_dimension_numbers<[1], [0], [0], [1], [0, 0, 1, 1], [], []>} : vector<2x32xf32>, vector<32x128xf32>, vector<2x128xf32> -> vector<2x128xf32>
    %10 = arith.addf %7, %9 : vector<2x128xf32>
    %c64 = arith.constant 64 : index
    %c0_9 = arith.constant 0 : index
    %11 = vector.load %arg8[%c64, %c0_9] : memref<65x128xf32, #tpu.memory_space<vmem>>, vector<1x128xf32>
    %12 = vector.broadcast %11 : vector<1x128xf32> to vector<2x128xf32>
    %13 = arith.addf %10, %12 : vector<2x128xf32>
    %c0_10 = arith.constant 0 : index
    %c0_11 = arith.constant 0 : index
    %14 = vector.load %arg9[%c0_10, %c0_11] : memref<2x128xf32, #tpu.memory_space<vmem>>, vector<2x128xf32>
    tpu.vector_store %arg9[%c0_10, %c0_11], %13 {strides = array<i32>} : memref<2x128xf32, #tpu.memory_space<vmem>>, vector<2x128xf32>,
    return
  }
  func.func @transform_0(%arg0: i32, %arg1: memref<8xi32, #tpu.memory_space<smem>>) -> (i32, i32, i32) {
    %c0_i32 = arith.constant 0 : i32
    %c0_i32_0 = arith.constant 0 : i32
    %c0_i32_1 = arith.constant 0 : i32
    %c0_i32_2 = arith.constant 0 : i32
    return %c0_i32, %c0_i32_0, %c0_i32_1 : i32, i32, i32
  }
  func.func @transform_1(%arg0: i32, %arg1: memref<8xi32, #tpu.memory_space<smem>>) -> (i32, i32, i32) {
    %c0_i32 = arith.constant 0 : i32
    %c0_i32_0 = arith.constant 0 : i32
    %c0_i32_1 = arith.constant 0 : i32
    %c0_i32_2 = arith.constant 0 : i32
    return %c0_i32, %c0_i32_0, %c0_i32_1 : i32, i32, i32
  }
  func.func @transform_2(%arg0: i32, %arg1: memref<8xi32, #tpu.memory_space<smem>>) -> (i32, i32, i32) {
    %c0_i32 = arith.constant 0 : i32
    %c0_i32_0 = arith.constant 0 : i32
    %c0_i32_1 = arith.constant 0 : i32
    %c0_i32_2 = arith.constant 0 : i32
    return %c0_i32, %c0_i32_0, %c0_i32_1 : i32, i32, i32
  }
  func.func @transform_3(%arg0: i32, %arg1: memref<8xi32, #tpu.memory_space<smem>>) -> (i32, i32) {
    %c0_i32 = arith.constant 0 : i32
    %c0_i32_0 = arith.constant 0 : i32
    %c0_i32_1 = arith.constant 0 : i32
    return %c0_i32, %c0_i32_0 : i32, i32
  }
  func.func @transform_4(%arg0: i32, %arg1: memref<8xi32, #tpu.memory_space<smem>>) -> (i32, i32) {
    %c0_i32 = arith.constant 0 : i32
    %c0_i32_0 = arith.constant 0 : i32
    %c0_i32_1 = arith.constant 0 : i32
    return %c0_i32, %c0_i32_0 : i32, i32
  }
  func.func @transform_5(%arg0: i32, %arg1: memref<8xi32, #tpu.memory_space<smem>>) -> (i32, i32) {
    %c0_i32 = arith.constant 0 : i32
    %c0_i32_0 = arith.constant 0 : i32
    %c0_i32_1 = arith.constant 0 : i32
    return %c0_i32, %c0_i32_0 : i32, i32
  }
  func.func @transform_6(%arg0: i32, %arg1: memref<8xi32, #tpu.memory_space<smem>>) -> (i32, i32) {
    %c0_i32 = arith.constant 0 : i32
    %c0_i32_0 = arith.constant 0 : i32
    return %c0_i32, %arg0 : i32, i32
  }
  func.func @transform_7(%arg0: i32, %arg1: memref<8xi32, #tpu.memory_space<smem>>) -> (i32, i32) {
    %c0_i32 = arith.constant 0 : i32
    %c0_i32_0 = arith.constant 0 : i32
    return %c0_i32, %arg0 : i32, i32
  }
  func.func @transform_8(%arg0: i32, %arg1: memref<8xi32, #tpu.memory_space<smem>>) -> (i32, i32, i32) {
    %c0_i32 = arith.constant 0 : i32
    %c0_i32_0 = arith.constant 0 : i32
    %c0_i32_1 = arith.constant 0 : i32
    %c0_i32_2 = arith.constant 0 : i32
    return %c0_i32, %c0_i32_0, %c0_i32_1 : i32, i32, i32
  }
}

</mosaic_0001>

<bundles_post_ra>
// kernel: decoder_pallas.1
= control target key start
LH: loop header
LB: loop body
LE: loop exit
PB: predicated region body
PF: predicated region fallthrough
CT: control target
= control target key end

     0   :  { %s1499_s0 = inlined_call_operand.vmem [shape: s32[8], index: 0, kind: input, shape index: {}]   ;;  %s1500_s1 = inlined_call_operand.vmem [shape: f32[2,6,32], index: 1, kind: input, shape index: {}]   ;;  %s1501_s2 = inlined_call_operand.vmem [shape: f32[2,2,32], index: 2, kind: input, shape index: {}]   ;;  %s1502_s3 = inlined_call_operand.vmem [shape: f32[32,1,8], index: 3, kind: input, shape index: {}]   ;;  %s1503_s4 = inlined_call_operand.vmem [shape: f32[9,128], index: 4, kind: input, shape index: {}]   ;;  %s1504_s5 = inlined_call_operand.vmem [shape: f32[32,128], index: 5, kind: input, shape index: {}]   ;;  %s1505_s6 = inlined_call_operand.vmem [shape: f32[32,32], index: 6, kind: input, shape index: {}]   ;;  %s1506_s7 = inlined_call_operand.vmem [shape: f32[65,128], index: 7, kind: input, shape index: {}]   ;;  %s1507_s8 = inlined_call_operand.hbm [shape: f32[2,128], index: 8, kind: output, shape index: {0}]   ;;  %s1508_s9 = inlined_call_operand.vmem [shape: f32[2,2,32], index: 9, kind: output, shape index: {1}]  }
   0x1   :  { %s15_s11 = sshll.u32 %s1499_s0, 4  ;;  %s16_s11 = int_to_ptr.vmem [resolvable:$true] %s15_s11 }
   0x2   :  { %s1184_s12 = scalar_lea.vmem %s16_s11, 16  ;;  %p1189_p1 = scmp.lt.s32.totalorder %s16_s11, %s16_s11 }
   0x3   :  { %p1185_p0 = scmp.ne.s32.totalorder %s16_s11, %s1184_s12  ;;  %p1190_p2 = scmp.lt.s32.totalorder %s1184_s12, %s1184_s12 }
   0x5   :  { %p1191_p3 = por %p1190_p2, %p1189_p1 }
   0x7   :  { %p1192_p4 = pnand %p1191_p3, %p1185_p0 }
   0x9   :  { %1195 = shalt.err (!%p1192_p4)  }
   0xa   :  { %s1222_s13 = smov [#allocation5]  }
   0xb   :  { %18 = dma.vmem_to_smem %s16_s11, 16, %s1222_s13, [#allocation4] }
   0xc   :  { %1218 = dma.done.wait [#allocation4], 16 }
   0xd   :  { %1219 = vsyncadd [#allocation4], 4294967280 }
   0xe   :  { %20 = sfence }
   0xf   :  { %v154_v0 = vld [vmem:[%s1504_s5] sm:$0xff]  ;;  %v155_v1 = vld [vmem:[%s1504_s5 + $0x8] sm:$0xff]  ;;  %v156_v2 = vld [vmem:[%s1504_s5 + $0x10] sm:$0xff]  ;;  %v1223_v3 = vmov 0.0|0.0   ;;  %v1224_v5 = vmov 0.0   ;;  %s40_s23 = sld [smem:[#allocation5]] }
  0x10   :  { %1097 = vmatprep.subr.bf16.mxu1 %v1223_v3  ;;  %v1294_v4 = vpack.c.bf16 %v155_v1, %v154_v0  ;;  %1015 = vmatprep.subr.mxu0 %v1224_v5  ;;  %v157_v6 = vld [vmem:[%s1504_s5 + $0x18] sm:$0xff]  ;;  %v74_v7 = vld [vmem:[%s1503_s4] sm:$0xff]  ;;  %vm1225_vm0 = vmmov 0   ;;  %s955_s24 = sld [smem:[#allocation5 + $0x1]]  ;;  %s956_s25 = sld [smem:[#allocation5 + $0x2]] }
  0x11   :  { %1016 = vmatpush3.msra.mxu0 %v74_v7  ;;  %1017 = vmatprep.mubr.msk.f32.mxu0 %vm1225_vm0, %v1224_v5  ;;  %v1306_v8 = vpack.c.bf16 %v157_v6, %v156_v2  ;;  %s957_s26 = sld [smem:[#allocation5 + $0x3]]  ;;  %s958_s27 = sld [smem:[#allocation5 + $0x4]] }
  0x12   :  { %1099 = vmatpush3.bf16.msra.mxu1 %v1294_v4  ;;  %1028 = vmatprep.mubr.msk.f32.mxu1 %vm1225_vm0, %v1224_v5  ;;  %s959_s5 = sld [smem:[#allocation5 + $0x5]]  ;;  %s960_s28 = sld [smem:[#allocation5 + $0x6]] }
  0x13   :  { %1100 = vmatprep.subr.bf16.mxu1 %v1223_v3  ;;  %1103 = vmatprep.subr.bf16.mxu0 %v1223_v3  ;;  %s1312_s29 = sld [smem:[#allocation5 + $0x7]] }
  0x14   :  { %21 = vsyncpa [#allocation7], 0  ;;  %vm43_vm1 = vcmask 57344   ;;  %v158_v9 = vld [vmem:[%s1501_s2] sm:$0x3]  ;;  %vm161_vm2 = vcmask 261120  }
  0x15   :  { %s41_s11 = scalar_lea.vmem %s1502_s3, %s40_s23  ;;  %vm80_vm3 = vcmask 64512   ;;  %v962_v21 = vld [vmem:[%s1503_s4 + $0x8] ss:$0 sm:$0xff]  ;;  %v964_v27 = vld [vmem:[%s1501_s2 + $0x2] sm:$0x3]  ;;  %vm712_vm4 = vcmask 259072  }
  0x16   :  { %1102 = vmatpush3.bf16.msra.mxu1 %v1306_v8  ;;  %v42_v10 = vld [vmem:[%s41_s11] sm:$0x1]  ;;  %s46_s16 = scalar_lea.vmem %s1502_s3, %s955_s24  ;;  %s50_s18 = scalar_lea.vmem %s1502_s3, %s956_s25  ;;  %vm719_vm5 = vcmask 1045504   ;;  %vm588_vm6 = vcmask 261126   ;;  %vm760_vm7 = vcmask 1041409   ;;  %vm763_vm8 = vcmask 254976  }
  0x17   :  { %1109 = vmatprep.subr.bf16.mxu1 %v1223_v3  ;;  %44 = vst.msk [vmem:[#allocation2] sm:$0x1] %vm43_vm1, %v42_v10  ;;  %v47_v11 = vld [vmem:[%s46_s16] sm:$0x1]  ;;  %s54_s21 = scalar_lea.vmem %s1502_s3, %s957_s26  ;;  %s58_s30 = scalar_lea.vmem %s1502_s3, %s958_s27 }
  0x18   :  { %v51_v12 = vld [vmem:[%s50_s18] sm:$0x1]  ;;  %48 = vst.msk [vmem:[#allocation2 + $0x1] sm:$0x1] %vm43_vm1, %v47_v11  ;;  %s62_s10 = scalar_lea.vmem %s1502_s3, %s959_s5  ;;  %s66_s13 = scalar_lea.vmem %s1502_s3, %s960_s28 }
  0x19   :  { %52 = vst.msk [vmem:[#allocation2 + $0x2] sm:$0x1] %vm43_vm1, %v51_v12  ;;  %v55_v13 = vld [vmem:[%s54_s21] sm:$0x1]  ;;  %1029 = vmatmul.mubr.msk.f32.vlgmr.msra.gmra.mrb[0].mxu1 %vm161_vm2, %v158_v9  ;;  %s70_s14 = scalar_lea.vmem %s1502_s3, %s1312_s29  ;;  %s1226_s28 = smov 64  }
  0x1a   :  { %v59_v14 = vld [vmem:[%s58_s30] sm:$0x1]  ;;  %56 = vst.msk [vmem:[#allocation2 + $0x3] sm:$0x1] %vm43_vm1, %v55_v13  ;;  %1111 = vmatpush3.bf16.msra.mxu1 %v1294_v4  ;;  %1050 = vmatprep.mubr.msk.f32.mxu1 %vm1225_vm0, %v1224_v5  ;;  %s1227_s16 = smov 32   ;;  %s1229_s24 = smov 96  }
  0x1b   :  { %60 = vst.msk [vmem:[#allocation2 + $0x4] sm:$0x1] %vm43_vm1, %v59_v14  ;;  %v63_v15 = vld [vmem:[%s62_s10] sm:$0x1]  ;;  %1112 = vmatprep.subr.bf16.mxu1 %v1223_v3 }
  0x1c   :  { %v67_v16 = vld [vmem:[%s66_s13] sm:$0x1]  ;;  %64 = vst.msk [vmem:[#allocation2 + $0x5] sm:$0x1] %vm43_vm1, %v63_v15 }
  0x1d   :  { %68 = vst.msk [vmem:[#allocation2 + $0x6] sm:$0x1] %vm43_vm1, %v67_v16  ;;  %v71_v17 = vld [vmem:[%s70_s14] sm:$0x1] }
  0x1e   :  { %72 = vst.msk [vmem:[#allocation2 + $0x7] sm:$0x1] %vm43_vm1, %v71_v17  ;;  %1114 = vmatpush3.bf16.msra.mxu1 %v1306_v8 }
  0x1f   :  { %1121 = vmatprep.subr.bf16.mxu1 %v1223_v3 }
  0x25   :  { %v73_v18 = vld [vmem:[#allocation2] sm:$0xff] }
  0x26   :  { %1018 = vmatmul.mubr.msk.f32.vlgmr.msra.gmra.mrb[0].mxu0 %vm80_vm3, %v73_v18 }
  0x27   :  { %1105 = vmatpush3.bf16.msra.mxu0 %v1294_v4  ;;  %1039 = vmatprep.mubr.msk.f32.mxu0 %vm1225_vm0, %v1224_v5 }
  0x28   :  { %1106 = vmatprep.subr.bf16.mxu0 %v1223_v3 }
  0x2b   :  { %1108 = vmatpush3.bf16.msra.mxu0 %v1306_v8 }
  0x2c   :  { %1115 = vmatprep.subr.bf16.mxu0 %v1223_v3 }
  0xec   :  { %v231_v19 = vpop.f32.mrb[0].mxu1 }
  0xed   :  { %v1030_v20 = vpop.f32.mrb[1].mxu1 }
  0xf9   :  { %v150_v22 = vpop.f32.mrb[0].mxu0 }
  0xfa   :  { %v1368_v23 = vadd.f32 %v962_v21, %v150_v22  ;;  %v1019_v24 = vpop.f32.mrb[1].mxu0 }
  0xfc   :  { %v235_v25 = vadd.f32 %v231_v19, %v1368_v23 }
  0xfe   :  { %1148 = vtanh.f32 %v235_v25  ;;  %v966_v28 = vmul.f32 -1.442695, %v235_v25 }
 0x100   :  { %1150 = vpow2.f32 %v966_v28 }
 0x108   :  { %v1149_v26 = vpop.eup %1148 }
 0x109   :  { %249 = vrot.lane.b32.xlu0 %v1149_v26, %s1226_s28 }
 0x10a   :  { %v1151_v29 = vpop.eup %1150 }
 0x10b   :  { %v239_v30 = vadd.f32 1.0, %v1151_v29 }
 0x10d   :  { %244 = vrot.lane.b32.xlu0 %v964_v27, %s1227_s16  ;;  %1152 = vrcp.f32 %v239_v30 }
 0x117   :  { %v1153_v31 = vpop.eup %1152 }
 0x17b   :  { %v250_v32 = vpop.permute.xlu0 %249 }
 0x17c   :  { %v252_v33 = vmul.f32 %v1153_v31, %v250_v32 }
 0x17e   :  { %254 = vrot.lane.b32.xlu1 %v252_v33, %s1227_s16 }
 0x17f   :  { %v245_v34 = vpop.permute.xlu0 %244 }
 0x180   :  { %v247_v35 = vmul.f32 %v1153_v31, %v245_v34 }
 0x1f0   :  { %v255_v36 = vpop.permute.xlu1 %254 }
 0x1f1   :  { %v257_v37 = vadd.f32 %v255_v36, %v247_v35  ;;  %v597_v36 = vld [vmem:[%s1505_s6 + $0x8] sm:$0xff] }
 0x1f3   :  { %1154 = vtanh.f32 %v257_v37  ;;  %v351_v53 = vrot.slane %v257_v37, 6  ;;  %v598_v37 = vld [vmem:[%s1505_s6 + $0x10] sm:$0xff] }
 0x1fd   :  { %v1155_v38 = vpop.eup %1154 }
 0x1fe   :  { %260 = vrot.lane.b32.xlu1 %v1155_v38, %s1226_s28 }
 0x270   :  { %v261_v39 = vpop.permute.xlu1 %260 }
 0x271   :  { %v263_v40 = vmul.f32 %v1153_v31, %v261_v39  ;;  %v599_v39 = vld [vmem:[%s1505_s6 + $0x18] sm:$0xff] }
 0x273   :  { %265 = vrot.lane.b32.xlu0 %v263_v40, %s1227_s16  ;;  %v1125_v40 = vpack.c.bf16 %v599_v39, %v598_v37 }
 0x2e5   :  { %v266_v41 = vpop.permute.xlu0 %265 }
 0x2e6   :  { %1040 = vmatmul.mubr.msk.f32.vlgmr.msra.gmra.mrb[2].mxu0 %vm161_vm2, %v266_v41 }
 0x2e7   :  { %1117 = vmatpush3.bf16.msra.mxu0 %v1294_v4  ;;  %1061 = vmatprep.mubr.msk.f32.mxu0 %vm1225_vm0, %v1224_v5 }
 0x2e8   :  { %1118 = vmatprep.subr.bf16.mxu0 %v1223_v3 }
 0x2eb   :  { %1120 = vmatpush3.bf16.msra.mxu0 %v1306_v8 }
 0x2ec   :  { %1127 = vmatprep.subr.bf16.mxu0 %v1223_v3 }
 0x3b9   :  { %v335_v42 = vpop.f32.mrb[2].mxu0 }
 0x3ba   :  { %v340_v43 = vrot.slane %v335_v42, 6  ;;  %v1041_v44 = vpop.f32.mrb[3].mxu0 }
 0x3bc   :  { %v342_v45 = vadd.f32 %v340_v43, %v1368_v23 }
 0x3be   :  { %1156 = vtanh.f32 %v342_v45  ;;  %v968_v47 = vmul.f32 -1.442695, %v342_v45 }
 0x3c0   :  { %1158 = vpow2.f32 %v968_v47 }
 0x3c8   :  { %v1157_v46 = vpop.eup %1156 }
 0x3c9   :  { %355 = vrot.lane.b32.xlu1 %v1157_v46, %s1226_s28  ;;  %v1228_v46 = vmov 1966171168  }
 0x3ca   :  { %v1159_v48 = vpop.eup %1158  ;;  %v679_v47 = vunpack.c.l.s4 %v1228_v46 }
 0x3cb   :  { %v346_v49 = vadd.f32 1.0, %v1159_v48  ;;  %v681_v48 = vlaneseq }
 0x3cd   :  { %1160 = vrcp.f32 %v346_v49  ;;  %v680_v49 = vunpack.c.0.s8 %v679_v47 }
 0x3d7   :  { %v1161_v50 = vpop.eup %1160 }
 0x3d8   :  { %v353_v54 = vmul.f32 %v1161_v50, %v351_v53 }
 0x43b   :  { %v356_v51 = vpop.permute.xlu1 %355 }
 0x43c   :  { %v358_v52 = vmul.f32 %v1161_v50, %v356_v51 }
 0x43e   :  { %360 = vrot.lane.b32.xlu0 %v358_v52, %s1227_s16 }
 0x4b0   :  { %v361_v55 = vpop.permute.xlu0 %360 }
 0x4b1   :  { %v363_v56 = vadd.f32 %v361_v55, %v353_v54 }
 0x4b3   :  { %1162 = vtanh.f32 %v363_v56  ;;  %v458_v11 = vrot.slane %v363_v56, 6 }
 0x4bd   :  { %v1163_v57 = vpop.eup %1162 }
 0x4be   :  { %366 = vrot.lane.b32.xlu1 %v1163_v57, %s1226_s28 }
 0x530   :  { %v367_v58 = vpop.permute.xlu1 %366 }
 0x531   :  { %v369_v59 = vmul.f32 %v1161_v50, %v367_v58  ;;  %v682_v50 = vshrl.u32 %v681_v48, 7  ;;  %v1427_v58 = vld [vmem:[%s1500_s1] sm:$0x3f] }
 0x533   :  { %v371_v60 = vrot.slane %v369_v59, 2  ;;  %v683_v51 = vsub.s32 %v680_v49, %v682_v50  ;;  %v702_v55 = vsub.s32 0, %v682_v50 }
 0x535   :  { %372 = vrot.lane.b32.xlu0 %v371_v60, %s1227_s16 }
 0x5a7   :  { %v373_v61 = vpop.permute.xlu0 %372 }
 0x5a8   :  { %1051 = vmatmul.mubr.msk.f32.vlgmr.msra.gmra.mrb[2].mxu1 %vm161_vm2, %v373_v61 }
 0x5a9   :  { %1072 = vmatprep.mubr.msk.f32.mxu1 %vm1225_vm0, %v1224_v5 }
 0x67b   :  { %v442_v62 = vpop.f32.mrb[2].mxu1 }
 0x67c   :  { %v447_v63 = vrot.slane %v442_v62, 4  ;;  %v1052_v0 = vpop.f32.mrb[3].mxu1 }
 0x67e   :  { %v449_v1 = vadd.f32 %v447_v63, %v1368_v23 }
 0x680   :  { %1164 = vtanh.f32 %v449_v1  ;;  %v970_v4 = vmul.f32 -1.442695, %v449_v1 }
 0x682   :  { %1166 = vpow2.f32 %v970_v4  ;;  %v768_v4 = vld [vmem:[%s1506_s7 + $0x8] sm:$0xff] }
 0x68a   :  { %v1165_v2 = vpop.eup %1164 }
 0x68b   :  { %462 = vrot.lane.b32.xlu1 %v1165_v2, %s1226_s28  ;;  %v767_v2 = vld [vmem:[%s1506_s7] sm:$0xff] }
 0x68c   :  { %v1167_v6 = vpop.eup %1166 }
 0x68d   :  { %v453_v7 = vadd.f32 1.0, %v1167_v6  ;;  %v1134_v6 = vpack.c.bf16 %v768_v4, %v767_v2 }
 0x68f   :  { %1168 = vrcp.f32 %v453_v7  ;;  %v769_v7 = vld [vmem:[%s1506_s7 + $0x10] sm:$0xff] }
 0x699   :  { %v1169_v8 = vpop.eup %1168 }
 0x69a   :  { %v460_v12 = vmul.f32 %v1169_v8, %v458_v11  ;;  %v772_v11 = vld [vmem:[%s1506_s7 + $0x28] sm:$0xff] }
 0x6fd   :  { %v463_v9 = vpop.permute.xlu1 %462 }
 0x6fe   :  { %v465_v10 = vmul.f32 %v1169_v8, %v463_v9 }
 0x700   :  { %467 = vrot.lane.b32.xlu0 %v465_v10, %s1227_s16  ;;  %v771_v10 = vld [vmem:[%s1506_s7 + $0x20] sm:$0xff] }
 0x772   :  { %v468_v13 = vpop.permute.xlu0 %467 }
 0x773   :  { %v470_v14 = vadd.f32 %v468_v13, %v460_v12  ;;  %v1128_v12 = vpack.c.bf16 %v772_v11, %v771_v10  ;;  %v773_v13 = vld [vmem:[%s1506_s7 + $0x30] sm:$0xff] }
 0x775   :  { %1170 = vtanh.f32 %v470_v14  ;;  %v565_v32 = vrot.slane %v470_v14, 6  ;;  %v774_v14 = vld [vmem:[%s1506_s7 + $0x38] sm:$0xff] }
 0x77f   :  { %v1171_v15 = vpop.eup %1170 }
 0x780   :  { %473 = vrot.lane.b32.xlu1 %v1171_v15, %s1226_s28  ;;  %v1131_v15 = vpack.c.bf16 %v774_v14, %v773_v13 }
 0x7f2   :  { %v474_v16 = vpop.permute.xlu1 %473 }
 0x7f3   :  { %v476_v17 = vmul.f32 %v1169_v8, %v474_v16  ;;  %v770_v8 = vld [vmem:[%s1506_s7 + $0x18] sm:$0xff] }
 0x7f4   :  { %v1137_v9 = vpack.c.bf16 %v770_v8, %v769_v7 }
 0x7f5   :  { %v478_v18 = vrot.slane %v476_v17, 4 }
 0x7f7   :  { %479 = vrot.lane.b32.xlu0 %v478_v18, %s1227_s16 }
 0x869   :  { %v480_v19 = vpop.permute.xlu0 %479 }
 0x86a   :  { %1062 = vmatmul.mubr.msk.f32.vlgmr.msra.gmra.mrb[4].mxu0 %vm161_vm2, %v480_v19 }
 0x86b   :  { %1083 = vmatprep.mubr.msk.f32.mxu0 %vm1225_vm0, %v1224_v5  ;;  %1129 = vmatpush3.bf16.msra.mxu0 %v1128_v12 }
 0x86c   :  { %1130 = vmatprep.subr.bf16.mxu0 %v1223_v3 }
 0x86f   :  { %1132 = vmatpush3.bf16.msra.mxu0 %v1131_v15 }
 0x93d   :  { %v549_v20 = vpop.f32.mrb[4].mxu0 }
 0x93e   :  { %v554_v21 = vrot.slane %v549_v20, 2  ;;  %v1063_v22 = vpop.f32.mrb[5].mxu0 }
 0x940   :  { %v556_v24 = vadd.f32 %v554_v21, %v1368_v23  ;;  %v596_v23 = vld [vmem:[%s1505_s6] sm:$0xff]  ;;  %s1230_s6 = smov [#allocation6]  }
 0x941   :  { %v1122_v38 = vpack.c.bf16 %v597_v36, %v596_v23  ;;  %s935_s22 = sshll.u32 %s1230_s6, 4  ;;  %s936_s22 = int_to_ptr.vmem [resolvable:$true] %s935_s22 }
 0x942   :  { %1172 = vtanh.f32 %v556_v24  ;;  %v972_v26 = vmul.f32 -1.442695, %v556_v24  ;;  %s1196_s23 = scalar_lea.vmem %s936_s22, 32  ;;  %p1201_p6 = scmp.lt.s32.totalorder %s936_s22, %s936_s22 }
 0x943   :  { %1123 = vmatpush3.bf16.msra.mxu1 %v1122_v38  ;;  %p1197_p5 = scmp.ne.s32.totalorder %s936_s22, %s1196_s23  ;;  %p1202_p7 = scmp.lt.s32.totalorder %s1196_s23, %s1196_s23 }
 0x944   :  { %1174 = vpow2.f32 %v972_v26  ;;  %1124 = vmatprep.subr.bf16.mxu1 %v1223_v3 }
 0x945   :  { %p1203_p8 = por %p1202_p7, %p1201_p6 }
 0x947   :  { %1126 = vmatpush3.bf16.msra.mxu1 %v1125_v40  ;;  %p1204_p9 = pnand %p1203_p8, %p1197_p5 }
 0x948   :  { %1133 = vmatprep.subr.bf16.mxu1 %v1223_v3 }
 0x94c   :  { %v1173_v25 = vpop.eup %1172 }
 0x94d   :  { %569 = vrot.lane.b32.xlu1 %v1173_v25, %s1226_s28 }
 0x94e   :  { %v1175_v27 = vpop.eup %1174 }
 0x94f   :  { %v560_v28 = vadd.f32 1.0, %v1175_v27 }
 0x951   :  { %1176 = vrcp.f32 %v560_v28 }
 0x95b   :  { %v1177_v29 = vpop.eup %1176 }
 0x95c   :  { %v567_v33 = vmul.f32 %v1177_v29, %v565_v32 }
 0x9bf   :  { %v570_v30 = vpop.permute.xlu1 %569 }
 0x9c0   :  { %v572_v31 = vmul.f32 %v1177_v29, %v570_v30 }
 0x9c2   :  { %574 = vrot.lane.b32.xlu0 %v572_v31, %s1227_s16 }
 0xa34   :  { %v575_v34 = vpop.permute.xlu0 %574 }
 0xa35   :  { %v577_v35 = vadd.f32 %v575_v34, %v567_v33 }
 0xa37   :  { %1178 = vtanh.f32 %v577_v35 }
 0xa41   :  { %v1179_v41 = vpop.eup %1178 }
 0xa42   :  { %580 = vrot.lane.b32.xlu1 %v1179_v41, %s1226_s28 }
 0xab4   :  { %v581_v42 = vpop.permute.xlu1 %580 }
 0xab5   :  { %v583_v43 = vmul.f32 %v1177_v29, %v581_v42 }
 0xab7   :  { %v600_v44 = vrot.slane %v583_v43, 6 }
 0xab9   :  { %601 = vrot.lane.b32.xlu0 %v600_v44, %s1227_s16 }
 0xb2b   :  { %v602_v45 = vpop.permute.xlu0 %601 }
 0xb2c   :  { %1073 = vmatmul.mubr.msk.f32.vlgmr.msra.gmra.mrb[4].mxu1 %vm161_vm2, %v602_v45 }
 0xb2d   :  { %1094 = vmatprep.mubr.msk.f32.mxu1 %vm1225_vm0, %v1224_v5  ;;  %v1432_v5 = vld [vmem:[%s1500_s1 + $0x8] sm:$0x3f]  ;;  %1135 = vmatpush3.bf16.msra.mxu1 %v1134_v6 }
 0xb2e   :  { %1136 = vmatprep.subr.bf16.mxu1 %v1223_v3 }
 0xb31   :  { %1138 = vmatpush3.bf16.msra.mxu1 %v1137_v9 }
 0xbff   :  { %v671_v52 = vpop.f32.mrb[4].mxu1 }
 0xc00   :  { %v684_v53 = vrot.slane %v671_v52, %v683_v51  ;;  %v1074_v54 = vpop.f32.mrb[5].mxu1 }
 0xc02   :  { %v685_v56 = vcombine.high %v684_v53, %v684_v53  ;;  %v692_v57 = vrot.slane %v684_v53, %v683_v51 }
 0xc04   :  { %v699_v59 = vrot.slane %v685_v56, %v683_v51  ;;  %v703_v60 = vrot.slane %v692_v57, %v702_v55 }
 0xc06   :  { %v710_v61 = vmul.f32 %v703_v60, %v1427_v58  ;;  %v707_v62 = vrot.slane %v699_v59, %v702_v55 }
 0xc08   :  { %v713_v63 = vsel %vm712_vm4, %v710_v61, 0.0  ;;  %v711_v0 = vmul.f32 %v707_v62, %v1432_v5  ;;  %v977_v62 = vld [vmem:[%s1506_s7 + $0x40] ss:$0 sm:$0xff] }
 0xc09   :  { %714 = vadd.xlane.f32.xlu1 %v713_v63 }
 0xc0a   :  { %v716_v1 = vsel %vm712_vm4, %v711_v0, 0.0 }
 0xc0b   :  { %717 = vadd.xlane.f32.xlu0 %v716_v1 }
 0xc1a   :  { %591 = vrot.lane.b32.xlu1 %v577_v35, %s1229_s24 }
 0xc21   :  { %585 = vrot.lane.b32.xlu0 %v583_v43, %s1227_s16 }
 0xc96   :  { %v715_v16 = vpop.xlane.xlu1 %714 }
 0xc97   :  { %v720_v18 = vsel %vm719_vm5, %v715_v16, 0.0 }
 0xc98   :  { %v718_v17 = vpop.xlane.xlu0 %717 }
 0xc99   :  { %v721_v19 = vsel %vm719_vm5, %v718_v17, 0.0 }
 0xc9a   :  { %v722_v20 = vadd.f32 %v721_v19, %v720_v18  ;;  %v592_v21 = vpop.permute.xlu1 %591 }
 0xc9b   :  { %973 = vst.msk [vmem:[%s1508_s9 - $0x4] sm:$0xc0] %vm588_vm6, %v592_v21 }
 0xc9c   :  { %v723_v22 = vsel %vm719_vm5, %v722_v20, -inf  ;;  %v586_v24 = vpop.permute.xlu0 %585 }
 0xc9d   :  { %v724_v25 = vrot.slane %v723_v22, 4  ;;  %589 = vst.msk [vmem:[%s1508_s9 - $0x6] sm:$0xc0] %vm588_vm6, %v586_v24 }
 0xc9f   :  { %v725_v3 = vmax.f32 %v723_v22, %v724_v25 }
 0xca1   :  { %v726_v26 = vrot.slane %v725_v3, 2 }
 0xca3   :  { %v727_v27 = vmax.f32 %v725_v3, %v726_v26 }
 0xca4   :  { %v765_v28 = vld [vmem:[%s1508_s9] sm:$0x3] }
 0xca5   :  { %v728_v29 = vrot.slane %v727_v27, 1  ;;  %1095 = vmatmul.mubr.msk.f32.vlgmr.msra.gmra.mrb[6].mxu1 %vm161_vm2, %v765_v28 }
 0xca7   :  { %v729_v30 = vmax.f32 %v727_v27, %v728_v29 }
 0xca9   :  { %v730_v31 = vsub.f32 %v722_v20, %v729_v30 }
 0xcab   :  { %v731_v32 = vmul.f32 1.442695, %v730_v31 }
 0xcad   :  { %1180 = vpow2.f32 %v731_v32 }
 0xcb7   :  { %v1181_v33 = vpop.eup %1180 }
 0xcb8   :  { %v733_v34 = vsel %vm719_vm5, %v1181_v33, 0.0 }
 0xcb9   :  { %v734_v35 = vrot.slane %v733_v34, 4 }
 0xcbb   :  { %v735_v23 = vadd.f32 %v734_v35, %v733_v34 }
 0xcbd   :  { %v736_v36 = vrot.slane %v735_v23, 2 }
 0xcbf   :  { %v737_v37 = vadd.f32 %v736_v36, %v735_v23 }
 0xcc1   :  { %v738_v38 = vrot.slane %v737_v37, 1 }
 0xcc3   :  { %v739_v39 = vadd.f32 %v738_v38, %v737_v37 }
 0xcc5   :  { %1182 = vrcp.f32 %v739_v39 }
 0xccf   :  { %v1183_v40 = vpop.eup %1182 }
 0xcd0   :  { %v741_v41 = vmul.f32 %v1183_v40, %v1181_v33 }
 0xcd2   :  { %v742_v42 = vmul.f32 %v741_v41, %v1427_v58  ;;  %v743_v43 = vmul.f32 %v741_v41, %v1432_v5 }
 0xcd4   :  { %v744_v44 = vsel %vm712_vm4, %v742_v42, 0.0  ;;  %v751_v45 = vsel %vm712_vm4, %v743_v43, 0.0 }
 0xcd5   :  { %v745_v46 = vrot.slane %v744_v44, 4  ;;  %v752_v47 = vrot.slane %v751_v45, 4 }
 0xcd7   :  { %v746_v48 = vadd.f32 %v745_v46, %v744_v44  ;;  %v753_v49 = vadd.f32 %v752_v47, %v751_v45 }
 0xcd9   :  { %v747_v50 = vrot.slane %v746_v48, 2  ;;  %v754_v51 = vrot.slane %v753_v49, 2 }
 0xcdb   :  { %v748_v52 = vadd.f32 %v747_v50, %v746_v48  ;;  %v755_v53 = vadd.f32 %v754_v51, %v753_v49 }
 0xcdd   :  { %v749_v54 = vrot.slane %v748_v52, 1  ;;  %v756_v55 = vrot.slane %v755_v53, 1 }
 0xcdf   :  { %v750_v56 = vadd.f32 %v749_v54, %v748_v52  ;;  %v757_v57 = vadd.f32 %v756_v55, %v755_v53 }
 0xce1   :  { %v761_v58 = vsel %vm760_vm7, %v757_v57, %v750_v56 }
 0xce2   :  { %764 = vst.msk [vmem:[#allocation3] sm:$0x3] %vm763_vm8, %v761_v58 }
 0xce9   :  { %v766_v59 = vld [vmem:[#allocation3] sm:$0x3] }
 0xcea   :  { %1084 = vmatmul.mubr.msk.f32.vlgmr.msra.gmra.mrb[6].mxu0 %vm161_vm2, %v766_v59 }
 0xd78   :  { %v918_v60 = vpop.f32.mrb[6].mxu1 }
 0xd79   :  { %v1096_v5 = vpop.f32.mrb[7].mxu1 }
 0xdbd   :  { %v845_v61 = vpop.f32.mrb[6].mxu0 }
 0xdbe   :  { %v919_v63 = vadd.f32 %v918_v60, %v845_v61  ;;  %v1085_v0 = vpop.f32.mrb[7].mxu0 }
 0xdc0   :  { %v927_v1 = vadd.f32 %v977_v62, %v919_v63 }
 0xdc2   :  { %928 = vst [vmem:[#allocation6] sm:$0x3] %v927_v1 }
 0xdc3   :  { %1207 = shalt.err (!%p1204_p9)
}
 0xdc4   :  { %s1208_s25 = scalar_lea.hbm %s1507_s8, 32 }
 0xdc5   :  { %p1209_p10 = scmp.ne.s32.totalorder %s1507_s8, %s1208_s25  ;;  %p1212_p11 = scmp.lt.u32.totalorder %s1208_s25, %s1507_s8 }
 0xdc7   :  { %p1214_p12 = pnand %p1212_p11, %p1209_p10 }
 0xdc9   :  { %1217 = shalt.err (!%p1214_p12)
}
 0xdca   :  { %938 = dma.vmem_to_hbm [thread:$0]  %s936_s22, 32, %s1507_s8, [#allocation7]  }
 0xdcb   :  { %1220 = dma.done.wait [#allocation7], 32  }
 0xdcc   :  { %1221 = vsyncadd [#allocation7], 4294967264 }
 0xdcd   :  { %946 = vsyncpa [#allocation7], 1 }

</bundles_post_ra>
